<compile_context>
chip_gen: v7x
topology: tpu7x:2x2x1
jax: 0.10.0
libtpu: 0.0.40
codegen_flags: <defaults>
</compile_context>

<pallas_src>
import functools

import jax
import jax.numpy as jnp
import numpy as np
from jax.experimental import pallas as pl
from jax.experimental.pallas import tpu as pltpu

NEG_SLOPE = 0.01  # PyTorch LeakyReLU / F.leaky_relu default

# ------------------------- static module configuration ----------------------
FOC = 4
C_IN = 2 * FOC          # 8   discriminator input channels
C1 = 4 * FOC            # 16  layer1 Resblock output channels
C2 = 2 * FOC            # 8   layer2 Resblock output channels

# Parameter-slab layout (single f32 array -> ONE prologue DMA).
_W_COLS = 3 * C1                          # 48 weight columns (max 3*Cin)
_BIAS_COL = _W_COLS                       # col 48: folded-BN shift / head vector
R_W1 = 0                                  # (2*C1, 3*C_IN): conv1a rows 0:16, shortcut 16:32
R_W1B = R_W1 + 2 * C1                     # 32  (C1, 3*C1)
R_W2 = R_W1B + C1                         # 48  (2*C2, 3*C1): conv2a rows 0:8, shortcut 8:16
R_W2B = R_W2 + 2 * C2                     # 64  (C2, 3*C2)
R_WD = R_W2B + C2                         # 72  head conv1x1 vector (C2,)
SLAB_ROWS = R_WD + C2                     # 80
SLAB_SHAPE = (SLAB_ROWS, _W_COLS + 1)     # (80, 49)


# ----------------------------- kernel helpers -------------------------------

def _lrelu(v):
    return jnp.where(v > 0, v, NEG_SLOPE * v)


def _im2col_taps(x, seq_len):
    """k=3 / pad=1 im2col for a batch-on-lanes tile.

    x: (Cin, n_batch*seq_len), each batch element owning `seq_len` consecutive
    lanes.  Returns (3*Cin, n_batch*seq_len) with tap-major rows
    (row j*Cin + c  <->  x[c, l+j-1]); taps crossing a per-batch boundary are
    zeroed (the conv's zero padding).
    """
    _, total = x.shape
    nb = total // seq_len
    lane = jax.lax.broadcasted_iota(jnp.int32, x.shape, 1)
    left = pltpu.roll(x, shift=1, axis=1)              # x[c, l-1]  (circular)
    right = pltpu.roll(x, shift=total - 1, axis=1)     # x[c, l+1]  (circular)
    first = functools.reduce(jnp.logical_or,
                             [lane == b * seq_len for b in range(nb)])
    last = functools.reduce(jnp.logical_or,
                            [lane == (b + 1) * seq_len - 1 for b in range(nb)])
    left = jnp.where(first, 0.0, left)
    right = jnp.where(last, 0.0, right)
    return jnp.concatenate([left, x, right], axis=0)


def _maxpool3(v):
    """MaxPool1d(kernel=3, stride=3) along lanes.

    Safe with batch-on-lanes: each per-batch length is a multiple of 3 so no
    pooling window crosses a batch boundary (and no wrapped lane is selected).
    """
    _, total = v.shape
    out = total // 3
    m = jnp.maximum(v, pltpu.roll(v, shift=total - 1, axis=1))   # max(v[l], v[l+1])
    m = jnp.maximum(m, pltpu.roll(v, shift=total - 2, axis=1))   # ..., v[l+2]
    # Down-sample every 3rd lane with a tiny 0/1 select matmul (MXU is idle);
    # avoids strided-lane / reshape relayouts.
    row = jax.lax.broadcasted_iota(jnp.int32, (total, out), 0)
    col = jax.lax.broadcasted_iota(jnp.int32, (total, out), 1)
    sel = (row == 3 * col).astype(jnp.float32)
    return jnp.dot(m, sel, preferred_element_type=jnp.float32)


def _resblock(x, seq_len, w_a, b_a, w_b, b_b, cout):
    """Resblock (is_discriminator branch, stride=1, eval) + maxpool(3).

    w_a is the fused [conv1 ; 1x1-shortcut] im2col weight (2*cout, 3*cin); the
    shortcut only populates the centre-tap columns.  BatchNorm is folded into
    the weights host-side; b_* are the remaining per-channel shifts.
    """
    # TODO(synk): nn.Dropout layers are identity in eval mode and are omitted.
    z = jnp.dot(w_a, _im2col_taps(x, seq_len),
                preferred_element_type=jnp.float32) + b_a        # (2*cout, NL)
    a = _lrelu(z[0:cout, :])                                     # left branch
    sc = z[cout:2 * cout, :]                                     # shortcut branch
    h = jnp.dot(w_b, _im2col_taps(a, seq_len),
                preferred_element_type=jnp.float32) + b_b        # (cout, NL)
    return _maxpool3(_lrelu(h + sc))


# ------------------------------- fused kernel -------------------------------

def discriminator_kernel(x_ref, slab_ref, o_ref):
    n, _, seq = x_ref.shape                      # (N, C_IN, L), PyTorch layout
    # batch-on-lanes working tile: (C_IN, N*L); no wrapper transpose needed.
    x = jnp.concatenate([x_ref[b] for b in range(n)], axis=-1)

    # carve the packed parameter slab with static views (one DMA for all params)
    w1 = slab_ref[R_W1:R_W1 + 2 * C1, 0:3 * C_IN]                    # (32, 24)
    b1 = slab_ref[R_W1:R_W1 + 2 * C1, _BIAS_COL:_BIAS_COL + 1]       # (32, 1)
    w1b = slab_ref[R_W1B:R_W1B + C1, 0:3 * C1]                       # (16, 48)
    b1b = slab_ref[R_W1B:R_W1B + C1, _BIAS_COL:_BIAS_COL + 1]        # (16, 1)
    w2 = slab_ref[R_W2:R_W2 + 2 * C2, 0:3 * C1]                      # (16, 48)
    b2 = slab_ref[R_W2:R_W2 + 2 * C2, _BIAS_COL:_BIAS_COL + 1]       # (16, 1)
    w2b = slab_ref[R_W2B:R_W2B + C2, 0:3 * C2]                       # (8, 24)
    b2b = slab_ref[R_W2B:R_W2B + C2, _BIAS_COL:_BIAS_COL + 1]        # (8, 1)
    wd = slab_ref[R_WD:R_WD + C2, _BIAS_COL:_BIAS_COL + 1]           # (8, 1)

    y1 = _resblock(x, seq, w1, b1, w1b, b1b, C1)                     # (16, N*L/3)
    y2 = _resblock(y1, seq // 3, w2, b2, w2b, b2b, C2)               # (8,  N*L/9)

    # head: Conv1d(C2 -> 1, k=1, no bias) == channel (sublane) reduction; sigmoid
    probs = jax.nn.sigmoid(jnp.sum(y2 * wd, axis=0, keepdims=True))  # (1, N*L/9)
    l_out = seq // 9
    o_ref[...] = jnp.concatenate(
        [probs[:, b * l_out:(b + 1) * l_out] for b in range(n)], axis=0)


# ------------------------------- JAX wrapper ---------------------------------

_VMEM = pl.BlockSpec(memory_space=pltpu.MemorySpace.VMEM)


def discriminator_forward(x_ncl, slab, alpha=None):
    """x_ncl: (N, C_IN, L) PyTorch layout; returns (N, 1, L // 9).

    `alpha` is accepted for parity with Discriminator.forward(x, alpha); it only
    scales the gradient-reversal backward pass and does not affect the forward.
    """
    # TODO(synk): gradient-reversal (alpha) has no forward effect; a custom VJP
    # would be needed for training.
    del alpha
    n, _, seq = x_ncl.shape
    l_out = seq // 9                             # two maxpool(3) stages
    out = pl.pallas_call(
        discriminator_kernel,
        out_shape=jax.ShapeDtypeStruct((n, l_out), jnp.float32),
        in_specs=[_VMEM, _VMEM],
        out_specs=_VMEM,
        cost_estimate=pl.CostEstimate(flops=340_000, transcendentals=16,
                                      bytes_accessed=20_000),
    )(x_ncl, slab)
    return out.reshape(n, 1, l_out)              # PyTorch (N, num_domain=1, L')


# --------------------------- parameter construction --------------------------

def conv_weight(key, cout, cin, k):
    # PyTorch Conv1d weight layout: (Cout, Cin, K)
    scale = 1.0 / np.sqrt(cin * k)
    return scale * jax.random.normal(key, (cout, cin, k), jnp.float32)


def bn_params(key, c):
    k1, k2, k3, k4 = jax.random.split(key, 4)
    return dict(
        gamma=1.0 + 0.1 * jax.random.normal(k1, (c,), jnp.float32),
        beta=0.1 * jax.random.normal(k2, (c,), jnp.float32),
        mean=0.1 * jax.random.normal(k3, (c,), jnp.float32),
        var=jnp.abs(jax.random.normal(k4, (c,), jnp.float32)) + 0.5,
    )


def bn_affine(bn, eps=1e-5):
    scale = bn["gamma"] / jnp.sqrt(bn["var"] + eps)
    shift = bn["beta"] - bn["mean"] * scale
    return scale, shift


def make_raw_resblock(key, ci, co):
    k = jax.random.split(key, 6)
    return dict(
        w1=conv_weight(k[0], co, ci, 3), bn1=bn_params(k[3], co),
        w2=conv_weight(k[1], co, co, 3), bn2=bn_params(k[4], co),
        wsc=conv_weight(k[2], co, ci, 1), bnsc=bn_params(k[5], co),
    )


def _fold(w, bn):
    """Fold eval-mode BN scale into the conv weight; return im2col weight
    (Cout, K*Cin) with column = tap*Cin + cin, plus the per-channel shift."""
    scale, shift = bn_affine(bn)
    wf = w * scale[:, None, None]
    cout, cin, k = wf.shape
    return jnp.transpose(wf, (0, 2, 1)).reshape(cout, k * cin), shift


def make_param_slab(raw1, raw2, wd_raw):
    w1a, b1a = _fold(raw1["w1"], raw1["bn1"])      # (16, 24)
    w1s, b1s = _fold(raw1["wsc"], raw1["bnsc"])    # (16, 8)
    w1b, b1b = _fold(raw1["w2"], raw1["bn2"])      # (16, 48)
    w2a, b2a = _fold(raw2["w1"], raw2["bn1"])      # (8, 48)
    w2s, b2s = _fold(raw2["wsc"], raw2["bnsc"])    # (8, 16)
    w2b, b2b = _fold(raw2["w2"], raw2["bn2"])      # (8, 24)
    wd = wd_raw[:, :, 0].reshape(-1)               # (8,)

    # fuse the 1x1 shortcut into the centre-tap columns of the first conv weight
    w1 = jnp.zeros((2 * C1, 3 * C_IN), jnp.float32)
    w1 = w1.at[0:C1, :].set(w1a).at[C1:, C_IN:2 * C_IN].set(w1s)
    w2 = jnp.zeros((2 * C2, 3 * C1), jnp.float32)
    w2 = w2.at[0:C2, :].set(w2a).at[C2:, C1:2 * C1].set(w2s)

    slab = jnp.zeros(SLAB_SHAPE, jnp.float32)
    slab = slab.at[R_W1:R_W1 + 2 * C1, 0:3 * C_IN].set(w1)
    slab = slab.at[R_W1B:R_W1B + C1, 0:3 * C1].set(w1b)
    slab = slab.at[R_W2:R_W2 + 2 * C2, 0:3 * C1].set(w2)
    slab = slab.at[R_W2B:R_W2B + C2, 0:3 * C2].set(w2b)
    slab = slab.at[R_W1:R_W1 + 2 * C1, _BIAS_COL].set(jnp.concatenate([b1a, b1s]))
    slab = slab.at[R_W1B:R_W1B + C1, _BIAS_COL].set(b1b)
    slab = slab.at[R_W2:R_W2 + 2 * C2, _BIAS_COL].set(jnp.concatenate([b2a, b2s]))
    slab = slab.at[R_W2B:R_W2B + C2, _BIAS_COL].set(b2b)
    slab = slab.at[R_WD:R_WD + C2, _BIAS_COL].set(wd)
    return slab


# ------------------------------ pure-JAX reference ---------------------------
# Un-fused, un-folded math (verifies BN fold, shortcut fusion, tap order, pool).

def _conv3_ref(x, w):
    # x: (N, L, Cin) channels-last; w: (Cout, Cin, 3) PyTorch layout
    seq = x.shape[1]
    xp = jnp.pad(x, ((0, 0), (1, 1), (0, 0)))
    return sum(jnp.einsum("nlc,dc->nld", xp[:, t:t + seq, :], w[:, :, t])
               for t in range(3))


def _resblock_ref(x, raw):
    s1, b1 = bn_affine(raw["bn1"])
    s2, b2 = bn_affine(raw["bn2"])
    ss, bs = bn_affine(raw["bnsc"])
    h = _lrelu(_conv3_ref(x, raw["w1"]) * s1 + b1)
    h = _conv3_ref(h, raw["w2"]) * s2 + b2
    sc = jnp.einsum("nlc,dc->nld", x, raw["wsc"][:, :, 0]) * ss + bs
    out = _lrelu(h + sc)
    n, seq, c = out.shape
    return jnp.max(out.reshape(n, seq // 3, 3, c), axis=2)


# ------------------------------------ main -----------------------------------

if __name__ == "__main__":
    key = jax.random.PRNGKey(0)
    keys = jax.random.split(key, 4)

    N, L = 2, 36                                      # PyTorch input (N, 8, 36)
    x_ncl = jax.random.normal(keys[0], (N, C_IN, L), jnp.float32)
    alpha = jnp.float32(0.5)                          # unused by the forward math

    raw1 = make_raw_resblock(keys[1], C_IN, C1)       # layer1 block: 8 -> 16
    raw2 = make_raw_resblock(keys[2], C1, C2)         # layer2 block: 16 -> 8
    wd_raw = conv_weight(keys[3], 1, C2, 1)           # head conv1x1 (1, 8, 1)
    slab = make_param_slab(raw1, raw2, wd_raw)

    out_ncl = discriminator_forward(x_ncl, slab, alpha)        # (2, 1, 4)
    jax.block_until_ready(out_ncl)

    # correctness check vs. plain-JAX reference of the same module math
    xr = jnp.transpose(x_ncl, (0, 2, 1))
    r = _resblock_ref(xr, raw1)
    r = _resblock_ref(r, raw2)
    r = jax.nn.sigmoid(jnp.einsum("nlc,dc->nld", r, wd_raw[:, :, 0]))
    r_ncl = jnp.transpose(r, (0, 2, 1))

    assert out_ncl.shape == (N, 1, L // 9), out_ncl.shape
    assert jnp.allclose(out_ncl, r_ncl, rtol=1e-4, atol=1e-4), float(
        jnp.max(jnp.abs(out_ncl - r_ncl)))
    print("KERNEL_OK")
</pallas_src>

<mosaic_0001>
module attributes {stable_mosaic.version = 11 : i64} {
  func.func @discriminator_kernel(%arg0: memref<2x8x36xf32, #tpu.memory_space<vmem>>, %arg1: memref<80x49xf32, #tpu.memory_space<vmem>>, %arg2: memref<2x4xf32, #tpu.memory_space<vmem>>) attributes {dimension_semantics = [], scalar_prefetch = 0 : i64, scratch_operands = 0 : i64, tpu.core_type = #tpu.core_type<tc>} {
    %c0 = arith.constant 0 : index
    %c0_0 = arith.constant 0 : index
    %c0_1 = arith.constant 0 : index
    %0 = vector.load %arg0[%c0, %c0_0, %c0_1] : memref<2x8x36xf32, #tpu.memory_space<vmem>>, vector<1x8x36xf32>
    %1 = vector.shape_cast %0 : vector<1x8x36xf32> to vector<8x36xf32>
    %c1 = arith.constant 1 : index
    %c0_2 = arith.constant 0 : index
    %c0_3 = arith.constant 0 : index
    %2 = vector.load %arg0[%c1, %c0_2, %c0_3] : memref<2x8x36xf32, #tpu.memory_space<vmem>>, vector<1x8x36xf32>
    %3 = vector.shape_cast %2 : vector<1x8x36xf32> to vector<8x36xf32>
    %4 = tpu.concatenate %1, %3 in 1 : vector<8x36xf32>, vector<8x36xf32> -> vector<8x72xf32>
    %c0_4 = arith.constant 0 : index
    %c0_5 = arith.constant 0 : index
    %5 = vector.load %arg1[%c0_4, %c0_5] : memref<80x49xf32, #tpu.memory_space<vmem>>, vector<32x24xf32>
    %c0_6 = arith.constant 0 : index
    %c48 = arith.constant 48 : index
    %6 = vector.load %arg1[%c0_6, %c48] : memref<80x49xf32, #tpu.memory_space<vmem>>, vector<32x1xf32>
    %c32 = arith.constant 32 : index
    %c0_7 = arith.constant 0 : index
    %7 = vector.load %arg1[%c32, %c0_7] : memref<80x49xf32, #tpu.memory_space<vmem>>, vector<16x48xf32>
    %c32_8 = arith.constant 32 : index
    %c48_9 = arith.constant 48 : index
    %8 = vector.load %arg1[%c32_8, %c48_9] : memref<80x49xf32, #tpu.memory_space<vmem>>, vector<16x1xf32>
    %c48_10 = arith.constant 48 : index
    %c0_11 = arith.constant 0 : index
    %9 = vector.load %arg1[%c48_10, %c0_11] : memref<80x49xf32, #tpu.memory_space<vmem>>, vector<16x48xf32>
    %c48_12 = arith.constant 48 : index
    %c48_13 = arith.constant 48 : index
    %10 = vector.load %arg1[%c48_12, %c48_13] : memref<80x49xf32, #tpu.memory_space<vmem>>, vector<16x1xf32>
    %c64 = arith.constant 64 : index
    %c0_14 = arith.constant 0 : index
    %11 = vector.load %arg1[%c64, %c0_14] : memref<80x49xf32, #tpu.memory_space<vmem>>, vector<8x24xf32>
    %c64_15 = arith.constant 64 : index
    %c48_16 = arith.constant 48 : index
    %12 = vector.load %arg1[%c64_15, %c48_16] : memref<80x49xf32, #tpu.memory_space<vmem>>, vector<8x1xf32>
    %c72 = arith.constant 72 : index
    %c48_17 = arith.constant 48 : index
    %13 = vector.load %arg1[%c72, %c48_17] : memref<80x49xf32, #tpu.memory_space<vmem>>, vector<8x1xf32>
    %14 = tpu.iota {dimensions = array<i32: 1>} : vector<8x72xi32>
    %c1_i32 = arith.constant 1 : i32
    %15 = tpu.dynamic_rotate %4 by %c1_i32 dim 1 : vector<8x72xf32>, i32 -> vector<8x72xf32>
    %c71_i32 = arith.constant 71 : i32
    %16 = tpu.dynamic_rotate %4 by %c71_i32 dim 1 : vector<8x72xf32>, i32 -> vector<8x72xf32>
    %c0_i32 = arith.constant 0 : i32
    %17 = vector.broadcast %c0_i32 : i32 to vector<8x72xi32>
    %18 = arith.cmpi eq, %14, %17 : vector<8x72xi32>
    %c36_i32 = arith.constant 36 : i32
    %19 = vector.broadcast %c36_i32 : i32 to vector<8x72xi32>
    %20 = arith.cmpi eq, %14, %19 : vector<8x72xi32>
    %21 = arith.ori %18, %20 : vector<8x72xi1>
    %c35_i32 = arith.constant 35 : i32
    %22 = vector.broadcast %c35_i32 : i32 to vector<8x72xi32>
    %23 = arith.cmpi eq, %14, %22 : vector<8x72xi32>
    %c71_i32_18 = arith.constant 71 : i32
    %24 = vector.broadcast %c71_i32_18 : i32 to vector<8x72xi32>
    %25 = arith.cmpi eq, %14, %24 : vector<8x72xi32>
    %26 = arith.ori %23, %25 : vector<8x72xi1>
    %cst = arith.constant 0.000000e+00 : f32
    %27 = vector.broadcast %cst : f32 to vector<8x72xf32>
    %28 = arith.select %21, %27, %15 : vector<8x72xi1>, vector<8x72xf32>
    %cst_19 = arith.constant 0.000000e+00 : f32
    %29 = vector.broadcast %cst_19 : f32 to vector<8x72xf32>
    %30 = arith.select %26, %29, %16 : vector<8x72xi1>, vector<8x72xf32>
    %31 = tpu.concatenate %28, %4, %30 in 0 : vector<8x72xf32>, vector<8x72xf32>, vector<8x72xf32> -> vector<24x72xf32>
    %cst_20 = arith.constant dense<0.000000e+00> : vector<32x72xf32>
    %32 = tpu.matmul %5, %31, %cst_20 {dimension_numbers = #tpu.dot_dimension_numbers<[1], [0], [0], [1], [0, 0, 1, 1], [], []>} : vector<32x24xf32>, vector<24x72xf32>, vector<32x72xf32> -> vector<32x72xf32>
    %33 = vector.broadcast %6 : vector<32x1xf32> to vector<32x72xf32>
    %34 = arith.addf %32, %33 : vector<32x72xf32>
    %35 = vector.extract_strided_slice %34 {offsets = [0, 0], sizes = [16, 72], strides = [1, 1]} : vector<32x72xf32> to vector<16x72xf32>
    %cst_21 = arith.constant 0.000000e+00 : f32
    %36 = vector.broadcast %cst_21 : f32 to vector<16x72xf32>
    %37 = arith.cmpf ogt, %35, %36 : vector<16x72xf32>
    %cst_22 = arith.constant 0.00999999977 : f32
    %38 = vector.broadcast %cst_22 : f32 to vector<16x72xf32>
    %39 = arith.mulf %38, %35 : vector<16x72xf32>
    %40 = arith.select %37, %35, %39 : vector<16x72xi1>, vector<16x72xf32>
    %41 = vector.extract_strided_slice %34 {offsets = [16, 0], sizes = [16, 72], strides = [1, 1]} : vector<32x72xf32> to vector<16x72xf32>
    %42 = tpu.iota {dimensions = array<i32: 1>} : vector<16x72xi32>
    %c1_i32_23 = arith.constant 1 : i32
    %43 = tpu.dynamic_rotate %40 by %c1_i32_23 dim 1 : vector<16x72xf32>, i32 -> vector<16x72xf32>
    %c71_i32_24 = arith.constant 71 : i32
    %44 = tpu.dynamic_rotate %40 by %c71_i32_24 dim 1 : vector<16x72xf32>, i32 -> vector<16x72xf32>
    %c0_i32_25 = arith.constant 0 : i32
    %45 = vector.broadcast %c0_i32_25 : i32 to vector<16x72xi32>
    %46 = arith.cmpi eq, %42, %45 : vector<16x72xi32>
    %c36_i32_26 = arith.constant 36 : i32
    %47 = vector.broadcast %c36_i32_26 : i32 to vector<16x72xi32>
    %48 = arith.cmpi eq, %42, %47 : vector<16x72xi32>
    %49 = arith.ori %46, %48 : vector<16x72xi1>
    %c35_i32_27 = arith.constant 35 : i32
    %50 = vector.broadcast %c35_i32_27 : i32 to vector<16x72xi32>
    %51 = arith.cmpi eq, %42, %50 : vector<16x72xi32>
    %c71_i32_28 = arith.constant 71 : i32
    %52 = vector.broadcast %c71_i32_28 : i32 to vector<16x72xi32>
    %53 = arith.cmpi eq, %42, %52 : vector<16x72xi32>
    %54 = arith.ori %51, %53 : vector<16x72xi1>
    %cst_29 = arith.constant 0.000000e+00 : f32
    %55 = vector.broadcast %cst_29 : f32 to vector<16x72xf32>
    %56 = arith.select %49, %55, %43 : vector<16x72xi1>, vector<16x72xf32>
    %cst_30 = arith.constant 0.000000e+00 : f32
    %57 = vector.broadcast %cst_30 : f32 to vector<16x72xf32>
    %58 = arith.select %54, %57, %44 : vector<16x72xi1>, vector<16x72xf32>
    %59 = tpu.concatenate %56, %40, %58 in 0 : vector<16x72xf32>, vector<16x72xf32>, vector<16x72xf32> -> vector<48x72xf32>
    %cst_31 = arith.constant dense<0.000000e+00> : vector<16x72xf32>
    %60 = tpu.matmul %7, %59, %cst_31 {dimension_numbers = #tpu.dot_dimension_numbers<[1], [0], [0], [1], [0, 0, 1, 1], [], []>} : vector<16x48xf32>, vector<48x72xf32>, vector<16x72xf32> -> vector<16x72xf32>
    %61 = vector.broadcast %8 : vector<16x1xf32> to vector<16x72xf32>
    %62 = arith.addf %60, %61 : vector<16x72xf32>
    %63 = arith.addf %62, %41 : vector<16x72xf32>
    %cst_32 = arith.constant 0.000000e+00 : f32
    %64 = vector.broadcast %cst_32 : f32 to vector<16x72xf32>
    %65 = arith.cmpf ogt, %63, %64 : vector<16x72xf32>
    %cst_33 = arith.constant 0.00999999977 : f32
    %66 = vector.broadcast %cst_33 : f32 to vector<16x72xf32>
    %67 = arith.mulf %66, %63 : vector<16x72xf32>
    %68 = arith.select %65, %63, %67 : vector<16x72xi1>, vector<16x72xf32>
    %c71_i32_34 = arith.constant 71 : i32
    %69 = tpu.dynamic_rotate %68 by %c71_i32_34 dim 1 : vector<16x72xf32>, i32 -> vector<16x72xf32>
    %70 = arith.maximumf %68, %69 : vector<16x72xf32>
    %c70_i32 = arith.constant 70 : i32
    %71 = tpu.dynamic_rotate %68 by %c70_i32 dim 1 : vector<16x72xf32>, i32 -> vector<16x72xf32>
    %72 = arith.maximumf %70, %71 : vector<16x72xf32>
    %73 = tpu.iota {dimensions = array<i32: 0>} : vector<72x24xi32>
    %74 = tpu.iota {dimensions = array<i32: 1>} : vector<72x24xi32>
    %c3_i32 = arith.constant 3 : i32
    %75 = vector.broadcast %c3_i32 : i32 to vector<72x24xi32>
    %76 = arith.muli %75, %74 : vector<72x24xi32>
    %77 = arith.cmpi eq, %73, %76 : vector<72x24xi32>
    %78 = arith.extui %77 : vector<72x24xi1> to vector<72x24xi32>
    %79 = arith.sitofp %78 : vector<72x24xi32> to vector<72x24xf32>
    %cst_35 = arith.constant dense<0.000000e+00> : vector<16x24xf32>
    %80 = tpu.matmul %72, %79, %cst_35 {dimension_numbers = #tpu.dot_dimension_numbers<[1], [0], [0], [1], [0, 0, 1, 1], [], []>} : vector<16x72xf32>, vector<72x24xf32>, vector<16x24xf32> -> vector<16x24xf32>
    %81 = tpu.iota {dimensions = array<i32: 1>} : vector<16x24xi32>
    %c1_i32_36 = arith.constant 1 : i32
    %82 = tpu.dynamic_rotate %80 by %c1_i32_36 dim 1 : vector<16x24xf32>, i32 -> vector<16x24xf32>
    %c23_i32 = arith.constant 23 : i32
    %83 = tpu.dynamic_rotate %80 by %c23_i32 dim 1 : vector<16x24xf32>, i32 -> vector<16x24xf32>
    %c0_i32_37 = arith.constant 0 : i32
    %84 = vector.broadcast %c0_i32_37 : i32 to vector<16x24xi32>
    %85 = arith.cmpi eq, %81, %84 : vector<16x24xi32>
    %c12_i32 = arith.constant 12 : i32
    %86 = vector.broadcast %c12_i32 : i32 to vector<16x24xi32>
    %87 = arith.cmpi eq, %81, %86 : vector<16x24xi32>
    %88 = arith.ori %85, %87 : vector<16x24xi1>
    %c11_i32 = arith.constant 11 : i32
    %89 = vector.broadcast %c11_i32 : i32 to vector<16x24xi32>
    %90 = arith.cmpi eq, %81, %89 : vector<16x24xi32>
    %c23_i32_38 = arith.constant 23 : i32
    %91 = vector.broadcast %c23_i32_38 : i32 to vector<16x24xi32>
    %92 = arith.cmpi eq, %81, %91 : vector<16x24xi32>
    %93 = arith.ori %90, %92 : vector<16x24xi1>
    %cst_39 = arith.constant 0.000000e+00 : f32
    %94 = vector.broadcast %cst_39 : f32 to vector<16x24xf32>
    %95 = arith.select %88, %94, %82 : vector<16x24xi1>, vector<16x24xf32>
    %cst_40 = arith.constant 0.000000e+00 : f32
    %96 = vector.broadcast %cst_40 : f32 to vector<16x24xf32>
    %97 = arith.select %93, %96, %83 : vector<16x24xi1>, vector<16x24xf32>
    %98 = tpu.concatenate %95, %80, %97 in 0 : vector<16x24xf32>, vector<16x24xf32>, vector<16x24xf32> -> vector<48x24xf32>
    %cst_41 = arith.constant dense<0.000000e+00> : vector<16x24xf32>
    %99 = tpu.matmul %9, %98, %cst_41 {dimension_numbers = #tpu.dot_dimension_numbers<[1], [0], [0], [1], [0, 0, 1, 1], [], []>} : vector<16x48xf32>, vector<48x24xf32>, vector<16x24xf32> -> vector<16x24xf32>
    %100 = vector.broadcast %10 : vector<16x1xf32> to vector<16x24xf32>
    %101 = arith.addf %99, %100 : vector<16x24xf32>
    %102 = vector.extract_strided_slice %101 {offsets = [0, 0], sizes = [8, 24], strides = [1, 1]} : vector<16x24xf32> to vector<8x24xf32>
    %cst_42 = arith.constant 0.000000e+00 : f32
    %103 = vector.broadcast %cst_42 : f32 to vector<8x24xf32>
    %104 = arith.cmpf ogt, %102, %103 : vector<8x24xf32>
    %cst_43 = arith.constant 0.00999999977 : f32
    %105 = vector.broadcast %cst_43 : f32 to vector<8x24xf32>
    %106 = arith.mulf %105, %102 : vector<8x24xf32>
    %107 = arith.select %104, %102, %106 : vector<8x24xi1>, vector<8x24xf32>
    %108 = vector.extract_strided_slice %101 {offsets = [8, 0], sizes = [8, 24], strides = [1, 1]} : vector<16x24xf32> to vector<8x24xf32>
    %109 = tpu.iota {dimensions = array<i32: 1>} : vector<8x24xi32>
    %c1_i32_44 = arith.constant 1 : i32
    %110 = tpu.dynamic_rotate %107 by %c1_i32_44 dim 1 : vector<8x24xf32>, i32 -> vector<8x24xf32>
    %c23_i32_45 = arith.constant 23 : i32
    %111 = tpu.dynamic_rotate %107 by %c23_i32_45 dim 1 : vector<8x24xf32>, i32 -> vector<8x24xf32>
    %c0_i32_46 = arith.constant 0 : i32
    %112 = vector.broadcast %c0_i32_46 : i32 to vector<8x24xi32>
    %113 = arith.cmpi eq, %109, %112 : vector<8x24xi32>
    %c12_i32_47 = arith.constant 12 : i32
    %114 = vector.broadcast %c12_i32_47 : i32 to vector<8x24xi32>
    %115 = arith.cmpi eq, %109, %114 : vector<8x24xi32>
    %116 = arith.ori %113, %115 : vector<8x24xi1>
    %c11_i32_48 = arith.constant 11 : i32
    %117 = vector.broadcast %c11_i32_48 : i32 to vector<8x24xi32>
    %118 = arith.cmpi eq, %109, %117 : vector<8x24xi32>
    %c23_i32_49 = arith.constant 23 : i32
    %119 = vector.broadcast %c23_i32_49 : i32 to vector<8x24xi32>
    %120 = arith.cmpi eq, %109, %119 : vector<8x24xi32>
    %121 = arith.ori %118, %120 : vector<8x24xi1>
    %cst_50 = arith.constant 0.000000e+00 : f32
    %122 = vector.broadcast %cst_50 : f32 to vector<8x24xf32>
    %123 = arith.select %116, %122, %110 : vector<8x24xi1>, vector<8x24xf32>
    %cst_51 = arith.constant 0.000000e+00 : f32
    %124 = vector.broadcast %cst_51 : f32 to vector<8x24xf32>
    %125 = arith.select %121, %124, %111 : vector<8x24xi1>, vector<8x24xf32>
    %126 = tpu.concatenate %123, %107, %125 in 0 : vector<8x24xf32>, vector<8x24xf32>, vector<8x24xf32> -> vector<24x24xf32>
    %cst_52 = arith.constant dense<0.000000e+00> : vector<8x24xf32>
    %127 = tpu.matmul %11, %126, %cst_52 {dimension_numbers = #tpu.dot_dimension_numbers<[1], [0], [0], [1], [0, 0, 1, 1], [], []>} : vector<8x24xf32>, vector<24x24xf32>, vector<8x24xf32> -> vector<8x24xf32>
    %128 = vector.broadcast %12 : vector<8x1xf32> to vector<8x24xf32>
    %129 = arith.addf %127, %128 : vector<8x24xf32>
    %130 = arith.addf %129, %108 : vector<8x24xf32>
    %cst_53 = arith.constant 0.000000e+00 : f32
    %131 = vector.broadcast %cst_53 : f32 to vector<8x24xf32>
    %132 = arith.cmpf ogt, %130, %131 : vector<8x24xf32>
    %cst_54 = arith.constant 0.00999999977 : f32
    %133 = vector.broadcast %cst_54 : f32 to vector<8x24xf32>
    %134 = arith.mulf %133, %130 : vector<8x24xf32>
    %135 = arith.select %132, %130, %134 : vector<8x24xi1>, vector<8x24xf32>
    %c23_i32_55 = arith.constant 23 : i32
    %136 = tpu.dynamic_rotate %135 by %c23_i32_55 dim 1 : vector<8x24xf32>, i32 -> vector<8x24xf32>
    %137 = arith.maximumf %135, %136 : vector<8x24xf32>
    %c22_i32 = arith.constant 22 : i32
    %138 = tpu.dynamic_rotate %135 by %c22_i32 dim 1 : vector<8x24xf32>, i32 -> vector<8x24xf32>
    %139 = arith.maximumf %137, %138 : vector<8x24xf32>
    %140 = tpu.iota {dimensions = array<i32: 0>} : vector<24x8xi32>
    %141 = tpu.iota {dimensions = array<i32: 1>} : vector<24x8xi32>
    %c3_i32_56 = arith.constant 3 : i32
    %142 = vector.broadcast %c3_i32_56 : i32 to vector<24x8xi32>
    %143 = arith.muli %142, %141 : vector<24x8xi32>
    %144 = arith.cmpi eq, %140, %143 : vector<24x8xi32>
    %145 = arith.extui %144 : vector<24x8xi1> to vector<24x8xi32>
    %146 = arith.sitofp %145 : vector<24x8xi32> to vector<24x8xf32>
    %cst_57 = arith.constant dense<0.000000e+00> : vector<8x8xf32>
    %147 = tpu.matmul %139, %146, %cst_57 {dimension_numbers = #tpu.dot_dimension_numbers<[1], [0], [0], [1], [0, 0, 1, 1], [], []>} : vector<8x24xf32>, vector<24x8xf32>, vector<8x8xf32> -> vector<8x8xf32>
    %148 = vector.broadcast %13 : vector<8x1xf32> to vector<8x8xf32>
    %149 = arith.mulf %147, %148 : vector<8x8xf32>
    %cst_58 = arith.constant dense<0.000000e+00> : vector<8xf32>
    %150 = vector.multi_reduction <add>, %149, %cst_58 [0] : vector<8x8xf32> to vector<8xf32>
    %151 = vector.shape_cast %150 : vector<8xf32> to vector<1x8xf32>
    %152 = arith.negf %151 : vector<1x8xf32>
    %153 = math.exp %152 : vector<1x8xf32>
    %cst_59 = arith.constant 1.000000e+00 : f32
    %154 = vector.broadcast %cst_59 : f32 to vector<1x8xf32>
    %155 = arith.addf %154, %153 : vector<1x8xf32>
    %156 = arith.divf %154, %155 : vector<1x8xf32>
    %157 = vector.extract_strided_slice %156 {offsets = [0, 0], sizes = [1, 4], strides = [1, 1]} : vector<1x8xf32> to vector<1x4xf32>
    %158 = vector.extract_strided_slice %156 {offsets = [0, 4], sizes = [1, 4], strides = [1, 1]} : vector<1x8xf32> to vector<1x4xf32>
    %159 = tpu.concatenate %157, %158 in 0 : vector<1x4xf32>, vector<1x4xf32> -> vector<2x4xf32>
    %c0_60 = arith.constant 0 : index
    %c0_61 = arith.constant 0 : index
    %160 = vector.load %arg2[%c0_60, %c0_61] : memref<2x4xf32, #tpu.memory_space<vmem>>, vector<2x4xf32>
    tpu.vector_store %arg2[%c0_60, %c0_61], %159 {strides = array<i32>} : memref<2x4xf32, #tpu.memory_space<vmem>>, vector<2x4xf32>,
    return
  }
}

</mosaic_0001>

<bundles_post_ra>
// kernel: tpu_custom_call.1
= control target key start
LH: loop header
LB: loop body
LE: loop exit
PB: predicated region body
PF: predicated region fallthrough
CT: control target
= control target key end

     0   :  { %s1165_s11 = smov 36   ;;  %s1427_s0 = inlined_call_operand.vmem [shape: f32[2,8,36], index: 0, kind: input, shape index: {}]   ;;  %s1428_s1 = inlined_call_operand.vmem [shape: f32[80,49], index: 1, kind: input, shape index: {}]   ;;  %s1429_s2 = inlined_call_operand.hbm [shape: f32[2,4], index: 2, kind: output, shape index: {}]  }
   0x1   :  { %v820_v0 = vld [vmem:[%s1427_s0 + $0x8] sm:$0xff] }
   0x2   :  { %16 = vrot.lane.b32.xlu0 %v820_v0, %s1165_s11 }
   0x3   :  { %7 = vsyncpa [#allocation3], 0  ;;  %vm19_vm0 = vcmask 293888   ;;  %v12_v1 = vld [vmem:[%s1427_s0] sm:$0xff]  ;;  %s1166_s14 = smov 72   ;;  %vm33_vm1 = vcmask 1048128   ;;  %v31_v12 = vlaneseq }
   0x4   :  { %v21_v7 = vld [vmem:[%s1428_s1] sm:$0xff]  ;;  %vm80_vm2 = vcmask 195584   ;;  %s1167_s0 = smov 127   ;;  %v1168_v10 = vmov 48   ;;  %s1169_s17 = smov 57   ;;  %v22_v11 = vld [vmem:[%s1428_s1 + $0x8] sm:$0xff] }
   0x5   :  { %927 = vmatprep.mubr.msk.f32.mxu0 %vm80_vm2, %v21_v7  ;;  %1091 = vset.pattern.permute.xlu0 %v1168_v10  ;;  %v1216_v13 = vand.u32 127, %v31_v12  ;;  %vm52_vm8 = vcmask 465920   ;;  %vm1170_vm11 = vmmov 1   ;;  %v23_v33 = vld [vmem:[%s1428_s1 + $0x10] sm:$0xff]  ;;  %v24_v37 = vld [vmem:[%s1428_s1 + $0x18] sm:$0xff]  ;;  %v25_v48 = vld [vmem:[%s1428_s1 + $0x20] sm:$0xff] }
   0x6   :  { %1090 = vset.pattern.permute.xlu1 %v1168_v10  ;;  %v26_v50 = vld [vmem:[%s1428_s1 + $0x28] sm:$0xff]  ;;  %s1173_s28 = smov 126   ;;  %s1174_s29 = smov 24  }
   0x7   :  { %vm40_vm3 = vcmp.eq.s32.totalorder %v1216_v13, 0  ;;  %vm41_vm4 = vcmp.eq.s32.totalorder %v1216_v13, 36  ;;  %vm43_vm6 = vcmp.eq.s32.totalorder %v1216_v13, 35  ;;  %vm44_vm7 = vcmp.eq.s32.totalorder %v1216_v13, 71  ;;  %s1175_s4 = smov 105   ;;  %s1180_s11 = smov [#allocation2]  }
   0x8   :  { %vm1222_vm5 = vmor %vm40_vm3, %vm41_vm4  ;;  %s812_s12 = sshll.u32 %s1180_s11, 4  ;;  %s813_s12 = int_to_ptr.vmem [resolvable:$true] %s812_s12 }
   0x9   :  { %vm821_vm9 = vmneg %vm1222_vm5  ;;  %s1141_s13 = scalar_lea.vmem %s813_s12, 32  ;;  %p1146_p1 = scmp.lt.s32.totalorder %s813_s12, %s813_s12 }
   0xa   :  { %vm1230_vm10 = vmor %vm43_vm6, %vm44_vm7  ;;  %p1142_p0 = scmp.ne.s32.totalorder %s813_s12, %s1141_s13  ;;  %p1147_p2 = scmp.lt.s32.totalorder %s1141_s13, %s1141_s13 }
   0xb   :  { %vm1003_vm12 = vmpackc.low %vm1170_vm11, %vm821_vm9 }
   0xc   :  { %vm823_vm13 = vmneg %vm1230_vm10  ;;  %p1148_p3 = por %p1147_p2, %p1146_p1 }
   0xd   :  { %vm1009_vm4 = vmpackc.low %vm821_vm9, %vm821_vm9 }
   0xe   :  { %vm1019_vm6 = vmpackc.low %vm823_vm13, %vm823_vm13  ;;  %p1149_p4 = pnand %p1148_p3, %p1142_p0 }
  0x74   :  { %v17_v2 = vpop.permute.xlu0 %16 }
  0x75   :  { %v20_v3 = vsel %vm19_vm0, %v12_v1, %v17_v2  ;;  %vm228_vm0 = vcmask 392192  }
  0x76   :  { %34 = vrot.lane.b32.xlu0 %v20_v3, %s1166_s14 }
  0xe8   :  { %v35_v4 = vpop.permute.xlu0 %34 }
  0xe9   :  { %v36_v5 = vsel %vm33_vm1, %v35_v4, %v20_v3 }
  0xea   :  { %37 = vrot.lane.b32.xlu1 %v36_v5, %s1166_s14 }
 0x15c   :  { %v38_v6 = vpop.permute.xlu1 %37 }
 0x15d   :  { %v39_v8 = vsel %vm33_vm1, %v38_v6, %v20_v3 }
 0x15e   :  { %v1085_v9 = vpack.i.bf16 %v38_v6, %v39_v8  ;;  %56 = vrot.lane.b32.xlu0 %v39_v8, %s1167_s0 }
 0x160   :  { %1086 = vrot.lane.b32.xlu1 %v1085_v9, %s1169_s17 }
 0x162   :  { %67 = vperm.xlu0 %1091, %v22_v11  }
 0x164   :  { %62 = vperm.xlu1 %1090, %v21_v7  }
 0x1d0   :  { %v57_v21 = vpop.permute.xlu0 %56 }
 0x1d2   :  { %v1087_v15 = vpop.permute.xlu1 %1086 }
 0x1d3   :  { %v1089_v16 = vunpack.i.h.bf16 %v1087_v15  ;;  %v1088_v17 = vunpack.i.l.bf16 %v1087_v15 }
 0x1d5   :  { %v53_v19 = vsel %vm52_vm8, %v1088_v17, %v1089_v16  ;;  %v347_v17 = vshrl.u32 %v31_v12, 7  ;;  %v1171_v12 = vmov 1.0|1.0  }
 0x1d6   :  { %v1002_v20 = vpack.c.bf16 %v20_v3, %v53_v19  ;;  %v1290_v19 = vmul.u32 3, %v1216_v13 }
 0x1d7   :  { %v348_v18 = vadd.s32 8, %v347_v17 }
 0x1d8   :  { %1004 = vmatprep.subr.msk.bf16.mxu0 %vm1003_vm12, %v1002_v20 }
 0x1d9   :  { %1007 = vmatpush3.bf16.msk.msra.mxu0 %vm1003_vm12, %v1002_v20  ;;  %v1292_v20 = vadd.s32 16, %v347_v17  ;;  %vm358_vm9 = vcmp.eq.s32.totalorder %v348_v18, %v1290_v19  ;;  %v1176_v18 = vmov 0.0|0.0  }
 0x1da   :  { %925 = vmatprep.subr.msk.mxu0 %vm823_vm13, %v57_v21 }
 0x1db   :  { %vm359_vm10 = vcmp.eq.s32.totalorder %v1292_v20, %v1290_v19  ;;  %v30_v20 = vld [vmem:[%s1428_s1 + $0x48] sm:$0xff] }
 0x1dd   :  { %926 = vmatpush3.msk.msra.mxu0 %vm823_vm13, %v57_v21  ;;  %v350_v21 = vadd.s32 24, %v347_v17 }
 0x1de   :  { %928 = vmatmul.mubr.msk.f32.vlgmr.msra.gmra.mrb[0].mxu0 %vm80_vm2, %v22_v11 }
 0x1df   :  { %930 = vmatprep.mubr.msk.f32.mxu0 %vm80_vm2, %v23_v33  ;;  %vm360_vm13 = vcmp.eq.s32.totalorder %v350_v21, %v1290_v19  ;;  %v1178_v21 = vmov 0.0  }
 0x1e1   :  { %v68_v22 = vpop.permute.xlu0 %67 }
 0x1e2   :  { %931 = vmatmul.mubr.msk.f32.gmra.mrb[2].mxu0 %vm80_vm2, %v24_v37 }
 0x1e3   :  { %v63_v23 = vpop.permute.xlu1 %62  ;;  %945 = vmatprep.mubr.msk.f32.mxu0 %vm228_vm0, %v25_v48 }
 0x2b1   :  { %v929_v24 = vpop.f32.mrb[0].mxu0 }
 0x2b2   :  { %v161_v25 = vadd.f32 %v929_v24, %v68_v22  ;;  %v155_v26 = vpop.f32.mrb[1].mxu0  ;;  %v351_v22 = vadd.s32 32, %v347_v17 }
 0x2b3   :  { %v156_v27 = vadd.f32 %v155_v26, %v63_v23  ;;  %v352_v23 = vadd.s32 40, %v347_v17 }
 0x2b4   :  { %vm175_vm14 = vcmp.gt.f32.partialorder %v161_v25, 0.0  ;;  %v177_v28 = vmul.f32 0.01, %v161_v25 }
 0x2b5   :  { %vm174_vm15 = vcmp.gt.f32.partialorder %v156_v27, 0.0  ;;  %v176_v29 = vmul.f32 0.01, %v156_v27 }
 0x2b6   :  { %v179_v30 = vsel %vm175_vm14, %v161_v25, %v177_v28  ;;  %vm1028_vm14 = vmpackc.low %vm360_vm13, %vm359_vm10  ;;  %vm384_vm13 = vcmask 588800  }
 0x2b7   :  { %v178_v31 = vsel %vm174_vm15, %v156_v27, %v176_v29  ;;  %vm361_vm15 = vcmp.eq.s32.totalorder %v351_v22, %v1290_v19  ;;  %v353_v29 = vadd.s32 48, %v347_v17 }
 0x2b8   :  { %v1092_v32 = vpack.i.bf16 %v179_v30, %v178_v31  ;;  %v1014_v63 = vpack.c.bf16 %v179_v30, %v178_v31 }
 0x2ba   :  { %1093 = vrot.lane.b32.xlu1 %v1092_v32, %s1166_s14  ;;  %v1172_v32 = vmov 1.0  }
 0x32c   :  { %v1094_v34 = vpop.permute.xlu1 %1093 }
 0x32d   :  { %v1096_v35 = vunpack.i.h.bf16 %v1094_v34  ;;  %v1095_v36 = vunpack.i.l.bf16 %v1094_v34 }
 0x32f   :  { %v182_v38 = vsel %vm33_vm1, %v1095_v36, %v178_v31  ;;  %v185_v39 = vsel %vm33_vm1, %v1096_v35, %v179_v30 }
 0x330   :  { %v1097_v40 = vpack.i.bf16 %v185_v39, %v182_v38 }
 0x332   :  { %1098 = vrot.lane.b32.xlu1 %v1097_v40, %s1166_s14 }
 0x3a4   :  { %v1099_v41 = vpop.permute.xlu1 %1098 }
 0x3a5   :  { %v1101_v42 = vunpack.i.h.bf16 %v1099_v41  ;;  %v1100_v43 = vunpack.i.l.bf16 %v1099_v41 }
 0x3a7   :  { %v191_v44 = vsel %vm33_vm1, %v1101_v42, %v179_v30  ;;  %v190_v45 = vsel %vm33_vm1, %v1100_v43, %v178_v31  ;;  %v354_v30 = vadd.s32 56, %v347_v17  ;;  %v355_v31 = vadd.s32 64, %v347_v17 }
 0x3a8   :  { %v1107_v46 = vpack.i.bf16 %v1101_v42, %v191_v44  ;;  %v1102_v47 = vpack.i.bf16 %v1100_v43, %v190_v45  ;;  %v1112_v49 = vpack.i.bf16 %v191_v44, %v190_v45 }
 0x3aa   :  { %1108 = vrot.lane.b32.xlu1 %v1107_v46, %s1169_s17  ;;  %1103 = vrot.lane.b32.xlu0 %v1102_v47, %s1169_s17 }
 0x3ae   :  { %72 = vperm.xlu1 %1090, %v23_v33   ;;  %1113 = vrot.lane.b32.xlu0 %v1112_v49, %s1167_s0  ;;  %v27_v49 = vld [vmem:[%s1428_s1 + $0x30] sm:$0xff] }
 0x3b2   :  { %77 = vperm.xlu1 %1090, %v24_v37   ;;  %220 = vperm.xlu0 %1091, %v25_v48  }
 0x3b6   :  { %225 = vperm.xlu0 %1091, %v26_v50  }
 0x41c   :  { %v1109_v51 = vpop.permute.xlu1 %1108  ;;  %v1104_v52 = vpop.permute.xlu0 %1103 }
 0x41d   :  { %v1111_v53 = vunpack.i.h.bf16 %v1109_v51  ;;  %v1110_v54 = vunpack.i.l.bf16 %v1109_v51  ;;  %v1106_v55 = vunpack.i.h.bf16 %v1104_v52  ;;  %v1105_v56 = vunpack.i.l.bf16 %v1104_v52 }
 0x41f   :  { %v205_v57 = vsel %vm52_vm8, %v1110_v54, %v1111_v53  ;;  %v204_v58 = vsel %vm52_vm8, %v1105_v56, %v1106_v55  ;;  %vm357_vm8 = vcmp.eq.s32.totalorder %v347_v17, %v1290_v19 }
 0x420   :  { %v1008_v59 = vpack.c.bf16 %v205_v57, %v204_v58  ;;  %v1114_v60 = vpop.permute.xlu0 %1113  ;;  %vm1298_vm12 = vmpackc.low %vm358_vm9, %vm357_vm8  ;;  %vm365_vm9 = vcmp.eq.s32.totalorder %v355_v31, %v1290_v19 }
 0x421   :  { %v1116_v61 = vunpack.i.h.bf16 %v1114_v60  ;;  %v1115_v62 = vunpack.i.l.bf16 %v1114_v60  ;;  %1025 = vmatprep.subr.msk.bf16.mxu1 %vm1298_vm12, %v1171_v12 }
 0x422   :  { %1010 = vmatprep.subr.msk.bf16.mxu0 %vm1009_vm4, %v1008_v59  ;;  %1027 = vmatpush3.bf16.msk.msra.mxu1 %vm1298_vm12, %v1171_v12 }
 0x423   :  { %1013 = vmatpush3.bf16.msk.msra.mxu0 %vm1009_vm4, %v1008_v59  ;;  %v1018_v0 = vpack.c.bf16 %v1116_v61, %v1115_v62  ;;  %vm362_vm4 = vcmp.eq.s32.totalorder %v352_v23, %v1290_v19  ;;  %1029 = vmatprep.subr.msk.bf16.mxu1 %vm1028_vm14, %v1171_v12 }
 0x424   :  { %1015 = vmatprep.subr.bf16.mxu0 %v1014_v63 }
 0x426   :  { %1031 = vmatpush3.bf16.msk.msra.mxu1 %vm1028_vm14, %v1171_v12  ;;  %vm479_vm14 = vcmp.eq.s32.totalorder %v1216_v13, 12 }
 0x427   :  { %1017 = vmatpush3.bf16.msra.mxu0 %v1014_v63 }
 0x428   :  { %1020 = vmatprep.subr.msk.bf16.mxu0 %vm1019_vm6, %v1018_v0 }
 0x42b   :  { %1023 = vmatpush3.bf16.msk.msra.mxu0 %vm1019_vm6, %v1018_v0  ;;  %vm1032_vm6 = vmpackc.low %vm362_vm4, %vm361_vm15 }
 0x42c   :  { %1033 = vmatprep.subr.msk.bf16.mxu1 %vm1032_vm6, %v1171_v12  ;;  %vm1353_vm15 = vmor %vm40_vm3, %vm479_vm14  ;;  %vm1177_vm14 = vmmov 0  }
 0x42d   :  { %v73_v2 = vpop.permute.xlu1 %72  ;;  %1035 = vmatpush3.bf16.msk.msra.mxu1 %vm1032_vm6, %v1171_v12  ;;  %vm859_vm4 = vmneg %vm1353_vm15  ;;  %vm481_vm6 = vcmp.eq.s32.totalorder %v1216_v13, 11 }
 0x42e   :  { %946 = vmatmul.mubr.msk.f32.vlgmr.msra.gmra.mrb[2].mxu0 %vm228_vm0, %v26_v50 }
 0x42f   :  { %981 = vmatprep.mubr.msk.f32.mxu0 %vm228_vm0, %v27_v49 }
 0x431   :  { %v221_v1 = vpop.permute.xlu0 %220  ;;  %v78_v4 = vpop.permute.xlu1 %77 }
 0x432   :  { %v1065_v6 = vadd.f32 %v221_v1, %v73_v2 }
 0x435   :  { %v226_v3 = vpop.permute.xlu0 %225 }
 0x436   :  { %v1063_v5 = vadd.f32 %v226_v3, %v78_v4 }
 0x501   :  { %v947_v7 = vpop.f32.mrb[2].mxu0 }
 0x502   :  { %v1064_v8 = vadd.f32 %v1063_v5, %v947_v7  ;;  %v299_v9 = vpop.f32.mrb[3].mxu0  ;;  %v28_v7 = vld [vmem:[%s1428_s1 + $0x38] sm:$0xff] }
 0x503   :  { %v1066_v10 = vadd.f32 %v1065_v6, %v299_v9 }
 0x504   :  { %vm311_vm5 = vcmp.gt.f32.partialorder %v1064_v8, 0.0  ;;  %v313_v11 = vmul.f32 0.01, %v1064_v8 }
 0x505   :  { %vm310_vm7 = vcmp.gt.f32.partialorder %v1066_v10, 0.0  ;;  %v312_v14 = vmul.f32 0.01, %v1066_v10 }
 0x506   :  { %v1283_v15 = vsel %vm311_vm5, %v1064_v8, %v313_v11  ;;  %vm363_vm5 = vcmp.eq.s32.totalorder %v353_v29, %v1290_v19 }
 0x507   :  { %319 = vrot.lane.b32.xlu0 %v1283_v15, %s1166_s14  ;;  %v314_v16 = vsel %vm310_vm7, %v1066_v10, %v312_v14  ;;  %vm364_vm7 = vcmp.eq.s32.totalorder %v354_v30, %v1290_v19 }
 0x508   :  { %316 = vrot.lane.b32.xlu1 %v314_v16, %s1166_s14  ;;  %vm1036_vm8 = vmpackc.low %vm364_vm7, %vm363_vm5  ;;  %vm482_vm5 = vcmp.eq.s32.totalorder %v1216_v13, 23 }
 0x509   :  { %1037 = vmatprep.subr.msk.bf16.mxu1 %vm1036_vm8, %v1171_v12  ;;  %vm1041_vm7 = vmpackc.low %vm859_vm4, %vm859_vm4 }
 0x50a   :  { %1039 = vmatpush3.bf16.msk.msra.mxu1 %vm1036_vm8, %v1171_v12  ;;  %vm1365_vm3 = vmor %vm481_vm6, %vm482_vm5 }
 0x50b   :  { %964 = vmatprep.subr.msk.mxu1 %vm365_vm9, %v1172_v32  ;;  %vm863_vm8 = vmneg %vm1365_vm3 }
 0x50e   :  { %965 = vmatpush3.msk.msra.mxu1 %vm365_vm9, %v1172_v32  ;;  %vm1051_vm9 = vmpackc.low %vm863_vm8, %vm863_vm8 }
 0x50f   :  { %1056 = vmatprep.subr.bf16.mxu1 %v1176_v18 }
 0x579   :  { %v320_v25 = vpop.permute.xlu0 %319 }
 0x57a   :  { %v317_v26 = vpop.permute.xlu1 %316  ;;  %v321_v27 = vsel %vm33_vm1, %v320_v25, %v1283_v15  ;;  %v29_v25 = vld [vmem:[%s1428_s1 + $0x40] sm:$0xff]  ;;  %s1179_s1 = smov 124  }
 0x57b   :  { %324 = vrot.lane.b32.xlu0 %v321_v27, %s1166_s14  ;;  %v318_v28 = vsel %vm33_vm1, %v317_v26, %v314_v16 }
 0x57c   :  { %322 = vrot.lane.b32.xlu1 %v318_v28, %s1166_s14 }
 0x5ed   :  { %v325_v33 = vpop.permute.xlu0 %324 }
 0x5ee   :  { %v323_v34 = vpop.permute.xlu1 %322  ;;  %v327_v35 = vsel %vm33_vm1, %v325_v33, %v1283_v15 }
 0x5ef   :  { %332 = vrot.lane.b32.xlu0 %v327_v35, %s1167_s0  ;;  %v326_v36 = vsel %vm33_vm1, %v323_v34, %v314_v16  ;;  %vm466_vm1 = vcmask 1047744  }
 0x5f0   :  { %330 = vrot.lane.b32.xlu1 %v326_v36, %s1167_s0 }
 0x5f3   :  { %340 = vrot.lane.b32.xlu0 %v327_v35, %s1173_s28 }
 0x5f4   :  { %338 = vrot.lane.b32.xlu1 %v326_v36, %s1173_s28 }
 0x661   :  { %v333_v37 = vpop.permute.xlu0 %332 }
 0x662   :  { %v331_v38 = vpop.permute.xlu1 %330  ;;  %v337_v41 = vmax.f32 %v1283_v15, %v333_v37 }
 0x663   :  { %v336_v39 = vmax.f32 %v314_v16, %v331_v38 }
 0x665   :  { %v341_v40 = vpop.permute.xlu0 %340 }
 0x666   :  { %v339_v42 = vpop.permute.xlu1 %338  ;;  %v345_v44 = vmax.f32 %v337_v41, %v341_v40 }
 0x667   :  { %v344_v43 = vmax.f32 %v336_v39, %v339_v42 }
 0x669   :  { %966 = vmatprep.mubr.msk.f32.mxu1 %vm384_vm13, %v344_v43 }
 0x66a   :  { %967 = vmatmul.mubr.msk.f32.vlgmr.msra.gmra.mrb[0].mxu1 %vm384_vm13, %v345_v44 }
 0x66b   :  { %990 = vmatprep.mubr.msk.f32.mxu1 %vm1177_vm14, %v1178_v21 }
 0x73d   :  { %v968_v45 = vpop.f32.mrb[0].mxu1 }
 0x73e   :  { %v457_v46 = vpop.f32.mrb[1].mxu1 }
 0x73f   :  { %v1117_v47 = vpack.i.bf16 %v968_v45, %v457_v46  ;;  %v1046_v48 = vpack.c.bf16 %v968_v45, %v457_v46 }
 0x741   :  { %1118 = vrot.lane.b32.xlu1 %v1117_v47, %s1174_s29 }
 0x7b3   :  { %v1119_v50 = vpop.permute.xlu1 %1118 }
 0x7b4   :  { %v1121_v51 = vunpack.i.h.bf16 %v1119_v50  ;;  %v1120_v52 = vunpack.i.l.bf16 %v1119_v50 }
 0x7b6   :  { %v469_v53 = vsel %vm466_vm1, %v1120_v52, %v457_v46  ;;  %v472_v54 = vsel %vm466_vm1, %v1121_v51, %v968_v45 }
 0x7b7   :  { %v1122_v55 = vpack.i.bf16 %v472_v54, %v469_v53 }
 0x7b9   :  { %1123 = vrot.lane.b32.xlu0 %v1122_v55, %s1174_s29 }
 0x82b   :  { %v1124_v56 = vpop.permute.xlu0 %1123 }
 0x82c   :  { %v1126_v57 = vunpack.i.h.bf16 %v1124_v56  ;;  %v1125_v58 = vunpack.i.l.bf16 %v1124_v56 }
 0x82e   :  { %v477_v59 = vsel %vm466_vm1, %v1125_v58, %v457_v46  ;;  %v478_v60 = vsel %vm466_vm1, %v1126_v57, %v968_v45 }
 0x82f   :  { %v1132_v61 = vpack.i.bf16 %v478_v60, %v477_v59 }
 0x831   :  { %1133 = vrot.lane.b32.xlu0 %v1132_v61, %s1167_s0  ;;  %1128 = vrot.lane.b32.xlu1 %v1132_v61, %s1175_s4 }
 0x835   :  { %504 = vperm.xlu1 %1090, %v27_v49  }
 0x8a3   :  { %v1129_v63 = vpop.permute.xlu1 %1128  ;;  %v1134_v2 = vpop.permute.xlu0 %1133 }
 0x8a4   :  { %v1131_v0 = vunpack.i.h.bf16 %v1129_v63  ;;  %v1130_v1 = vunpack.i.l.bf16 %v1129_v63  ;;  %v1136_v5 = vunpack.i.h.bf16 %v1134_v2  ;;  %v1135_v6 = vunpack.i.l.bf16 %v1134_v2 }
 0x8a6   :  { %v1040_v4 = vpack.c.bf16 %v1131_v0, %v1130_v1  ;;  %v1050_v13 = vpack.c.bf16 %v1136_v5, %v1135_v6 }
 0x8a8   :  { %1042 = vmatprep.subr.msk.bf16.mxu0 %vm1041_vm7, %v1040_v4 }
 0x8a9   :  { %1045 = vmatpush3.bf16.msk.msra.mxu0 %vm1041_vm7, %v1040_v4 }
 0x8aa   :  { %1047 = vmatprep.subr.bf16.mxu0 %v1046_v48 }
 0x8ad   :  { %1049 = vmatpush3.bf16.msra.mxu0 %v1046_v48 }
 0x8ae   :  { %1052 = vmatprep.subr.msk.bf16.mxu0 %vm1051_vm9, %v1050_v13 }
 0x8b1   :  { %1055 = vmatpush3.bf16.msk.msra.mxu0 %vm1051_vm9, %v1050_v13 }
 0x8b4   :  { %982 = vmatmul.mubr.msk.f32.vlgmr.msra.gmra.mrb[4].mxu0 %vm228_vm0, %v28_v7  ;;  %v505_v9 = vpop.permute.xlu1 %504  ;;  %vm1058_vm0 = vmpackc.low %vm1170_vm11, %vm859_vm4 }
 0x987   :  { %v983_v8 = vpop.f32.mrb[4].mxu0 }
 0x988   :  { %v582_v10 = vpop.f32.mrb[5].mxu0 }
 0x989   :  { %v583_v11 = vadd.f32 %v582_v10, %v505_v9 }
 0x98b   :  { %vm591_vm13 = vcmp.gt.f32.partialorder %v583_v11, 0.0  ;;  %v592_v14 = vmul.f32 0.01, %v583_v11 }
 0x98d   :  { %v593_v15 = vsel %vm591_vm13, %v583_v11, %v592_v14 }
 0x98e   :  { %594 = vrot.lane.b32.xlu0 %v593_v15, %s1174_s29 }
 0xa00   :  { %v595_v16 = vpop.permute.xlu0 %594 }
 0xa01   :  { %v596_v17 = vsel %vm466_vm1, %v595_v16, %v593_v15 }
 0xa02   :  { %597 = vrot.lane.b32.xlu1 %v596_v17, %s1174_s29 }
 0xa74   :  { %v598_v22 = vpop.permute.xlu1 %597 }
 0xa75   :  { %v599_v23 = vsel %vm466_vm1, %v598_v22, %v593_v15 }
 0xa76   :  { %605 = vrot.lane.b32.xlu1 %v599_v23, %s1167_s0  ;;  %601 = vrot.lane.b32.xlu0 %v599_v23, %s1175_s4 }
 0xa7a   :  { %611 = vperm.xlu1 %1090, %v29_v25   ;;  %509 = vperm.xlu0 %1091, %v28_v7  }
 0xae8   :  { %v602_v26 = vpop.permute.xlu0 %601  ;;  %v606_v28 = vpop.permute.xlu1 %605 }
 0xae9   :  { %v1057_v27 = vpack.c.bf16 %v593_v15, %v602_v26 }
 0xaeb   :  { %1059 = vmatpush3.bf16.msk.msra.mxu1 %vm1058_vm0, %v1057_v27 }
 0xaec   :  { %988 = vmatprep.subr.mxu1 %v1178_v21 }
 0xaef   :  { %989 = vmatpush3.msk.msra.mxu1 %vm863_vm8, %v606_v28 }
 0xaf0   :  { %991 = vmatmul.mubr.msk.f32.vlgmr.msra.gmra.mrb[2].mxu1 %vm80_vm2, %v29_v25  ;;  %1060 = vmatprep.subr.bf16.mxu1 %v1176_v18 }
 0xaf1   :  { %1062 = vmatpush3.bf16.msk.msra.mxu1 %vm1298_vm12, %v1171_v12  ;;  %999 = vmatprep.mubr.msk.f32.mxu1 %vm1177_vm14, %v1178_v21  ;;  %vm804_vm12 = vcmask 25600  }
 0xaf2   :  { %997 = vmatprep.subr.mxu1 %v1178_v21 }
 0xaf5   :  { %998 = vmatpush3.msk.msra.mxu1 %vm359_vm10, %v1172_v32  ;;  %vm784_vm10 = vcmask 64512  }
 0xaf9   :  { %v510_v29 = vpop.permute.xlu0 %509  ;;  %v612_v30 = vpop.permute.xlu1 %611 }
 0xafa   :  { %v588_v33 = vadd.f32 %v983_v8, %v510_v29 }
 0xbc3   :  { %v682_v31 = vpop.f32.mrb[2].mxu1 }
 0xbc4   :  { %v683_v34 = vadd.f32 %v682_v31, %v612_v30  ;;  %v992_v35 = vpop.f32.mrb[3].mxu1 }
 0xbc6   :  { %v686_v36 = vadd.f32 %v683_v34, %v588_v33 }
 0xbc8   :  { %v688_v37 = vmul.f32 0.01, %v686_v36  ;;  %vm687_vm11 = vcmp.gt.f32.partialorder %v686_v36, 0.0 }
 0xbca   :  { %v689_v38 = vsel %vm687_vm11, %v686_v36, %v688_v37 }
 0xbcb   :  { %690 = vrot.lane.b32.xlu0 %v689_v38, %s1174_s29 }
 0xc3d   :  { %v691_v24 = vpop.permute.xlu0 %690 }
 0xc3e   :  { %v692_v12 = vsel %vm466_vm1, %v691_v24, %v689_v38 }
 0xc3f   :  { %693 = vrot.lane.b32.xlu1 %v692_v12, %s1174_s29 }
 0xcb1   :  { %v694_v39 = vpop.permute.xlu1 %693 }
 0xcb2   :  { %v695_v19 = vsel %vm466_vm1, %v694_v39, %v689_v38 }
 0xcb3   :  { %701 = vrot.lane.b32.xlu1 %v695_v19, %s1173_s28  ;;  %697 = vrot.lane.b32.xlu0 %v695_v19, %s1167_s0 }
 0xcb7   :  { %780 = vperm.xlu0 %1091, %v30_v20  }
 0xd25   :  { %v698_v32 = vpop.permute.xlu0 %697  ;;  %v702_v41 = vpop.permute.xlu1 %701 }
 0xd26   :  { %v700_v40 = vmax.f32 %v689_v38, %v698_v32 }
 0xd28   :  { %v704_v42 = vmax.f32 %v700_v40, %v702_v41 }
 0xd2a   :  { %1000 = vmatmul.mubr.msk.f32.vlgmr.msra.gmra.mrb[4].mxu1 %vm80_vm2, %v704_v42  ;;  %vm802_vm2 = vcmask 1040384  }
 0xd36   :  { %v781_v43 = vpop.permute.xlu0 %780 }
 0xdfd   :  { %v774_v44 = vpop.f32.mrb[4].mxu1 }
 0xdfe   :  { %v783_v45 = vmul.f32 %v781_v43, %v774_v44  ;;  %v1001_v46 = vpop.f32.mrb[5].mxu1 }
 0xe00   :  { %v785_v47 = vsel %vm784_vm10, %v783_v45, 0.0 }
 0xe01   :  { %v786_v48 = vrot.slane %v785_v47, 4 }
 0xe03   :  { %v787_v49 = vadd.f32 %v786_v48, %v785_v47 }
 0xe05   :  { %v788_v50 = vrot.slane %v787_v49, 2 }
 0xe07   :  { %v789_v51 = vadd.f32 %v788_v50, %v787_v49 }
 0xe09   :  { %v790_v52 = vrot.slane %v789_v51, 1 }
 0xe0b   :  { %v791_v53 = vadd.f32 %v790_v52, %v789_v51 }
 0xe0d   :  { %v878_v54 = vmul.f32 -1.442695, %v791_v53 }
 0xe0f   :  { %1137 = vpow2.f32 %v878_v54 }
 0xe19   :  { %v1138_v55 = vpop.eup %1137 }
 0xe1a   :  { %v795_v56 = vadd.f32 1.0, %v1138_v55 }
 0xe1c   :  { %1139 = vrcp.f32 %v795_v56 }
 0xe26   :  { %v1140_v57 = vpop.eup %1139 }
 0xe27   :  { %799 = vrot.lane.b32.xlu1 %v1140_v57, %s1179_s1 }
 0xe99   :  { %v800_v58 = vpop.permute.xlu1 %799 }
 0xe9a   :  { %v803_v59 = vsel %vm802_vm2, %v1140_v57, %v800_v58 }
 0xe9b   :  { %805 = vst.msk [vmem:[#allocation2] sm:$0x3] %vm804_vm12, %v803_v59 }
 0xe9c   :  { %1152 = shalt.err (!%p1149_p4)
}
 0xe9d   :  { %s1153_s16 = scalar_lea.hbm %s1429_s2, 32 }
 0xe9e   :  { %p1154_p5 = scmp.ne.s32.totalorder %s1429_s2, %s1153_s16  ;;  %p1157_p6 = scmp.lt.u32.totalorder %s1153_s16, %s1429_s2 }
 0xea0   :  { %p1159_p7 = pnand %p1157_p6, %p1154_p5 }
 0xea2   :  { %1162 = shalt.err (!%p1159_p7)
}
 0xea3   :  { %815 = dma.vmem_to_hbm [thread:$0]  %s813_s12, 32, %s1429_s2, [#allocation3]  }
 0xea4   :  { %1163 = dma.done.wait [#allocation3], 32  }
 0xea5   :  { %1164 = vsyncadd [#allocation3], 4294967264 }
 0xea6   :  { %819 = vsyncpa [#allocation3], 1 }

</bundles_post_ra>
